<compile_context>
chip_gen: v6e
topology: v6e:2x2x1
jax: 0.10.0
libtpu: 0.0.40
codegen_flags: <defaults>
</compile_context>

<pallas_src>
import functools

import jax
import jax.numpy as jnp
from jax.experimental import pallas as pl
from jax.experimental.pallas import tpu as pltpu

UNIT = 64            # per-branch hidden width (hard-coded 64 in the PyTorch module)
FUSED = 2 * UNIT     # 128 = fused Q|I hidden width = one full vreg lane span


def _fc_q_kernel(x_ref, slab_ref, out_ref, *, s_pad, num_actions):
    """Fused dual-branch MLP: both branches ride one 128-lane path."""
    A = num_actions
    r1 = s_pad                    # slab row where W2 starts
    r2 = s_pad + FUSED            # slab row where W3 starts
    rb = s_pad + 2 * FUSED        # slab row where the bias block starts

    x = x_ref[...]                                   # [B, S_pad]

    w1 = slab_ref[0:r1, :]                           # [S_pad, 128]  = [q1ᵀ | i1ᵀ]
    w2 = slab_ref[r1:r2, :]                          # [128, 128]    = blockdiag(q2ᵀ, i2ᵀ)
    w3 = slab_ref[r2:rb, :]                          # [128, 128]    = blockdiag(q3ᵀ, i3ᵀ) | 0
    bias_blk = slab_ref[rb:rb + 8, :]                # [8, 128] single aligned tile
    b1 = bias_blk[0:1, :]                            # [1, 128]
    b2 = bias_blk[1:2, :]                            # [1, 128]
    b3 = bias_blk[2:3, :]                            # [1, 128] (lanes 2A: are zero)

    h1 = jnp.maximum(
        jnp.dot(x, w1, preferred_element_type=jnp.float32) + b1, 0.0)   # [B, 128]
    h2 = jnp.maximum(
        jnp.dot(h1, w2, preferred_element_type=jnp.float32) + b2, 0.0)  # [B, 128]
    z3 = jnp.dot(h2, w3, preferred_element_type=jnp.float32) + b3       # [B, 128]

    q_val = z3[:, 0:A]                               # q3(q)      (no ReLU)
    i_act = jnp.maximum(z3[:, A:2 * A], 0.0)         # relu(i3(i))

    # numerically stable log_softmax over the action axis
    m = jnp.max(i_act, axis=1, keepdims=True)
    shifted = i_act - m
    lse = jnp.log(jnp.sum(jnp.exp(shifted), axis=1, keepdims=True))
    logp = shifted - lse

    # one merged output buffer -> single writeback DMA
    out_ref[:, 0:A] = q_val
    out_ref[:, A:2 * A] = logp
    out_ref[:, 2 * A:3 * A] = i_act


def pack_params(params, state_dim, num_actions):
    """One-time prep: transpose to [in, out], fuse Q|I, block-diagonalize, and
    pack every weight & bias into a single [S_pad + 2*128 + 8, 128] f32 slab."""
    A = num_actions
    s_pad = ((state_dim + 7) // 8) * 8               # sublane-align the W1 segment

    def t(name):                                     # [out, in] -> [in, out]
        return jnp.transpose(params[name + "_w"]).astype(jnp.float32)

    # layer 1: [S_pad, 128]
    w1 = jnp.concatenate([t("q1"), t("i1")], axis=1)
    w1 = jnp.pad(w1, ((0, s_pad - state_dim), (0, 0)))

    # layer 2: [128, 128]
    zh = jnp.zeros((UNIT, UNIT), jnp.float32)
    w2 = jnp.block([[t("q2"), zh], [zh, t("i2")]])

    # layer 3: [128, 128]  (lanes 2A: are zero padding)
    za = jnp.zeros((UNIT, A), jnp.float32)
    w3 = jnp.block([[t("q3"), za], [za, t("i3")]])
    w3 = jnp.pad(w3, ((0, 0), (0, FUSED - 2 * A)))

    # biases: rows 0/1/2 of an 8-row (sublane-aligned) block, lane-padded to 128
    b1 = jnp.concatenate([params["q1_b"], params["i1_b"]])
    b2 = jnp.concatenate([params["q2_b"], params["i2_b"]])
    b3 = jnp.pad(jnp.concatenate([params["q3_b"], params["i3_b"]]),
                 (0, FUSED - 2 * A))
    bias = jnp.zeros((8, FUSED), jnp.float32)
    bias = bias.at[0].set(b1).at[1].set(b2).at[2].set(b3)

    slab = jnp.concatenate([w1, w2, w3, bias], axis=0).astype(jnp.float32)
    return slab, s_pad


def fc_q_forward(state, slab, *, state_dim, num_actions, s_pad):
    """state: [B, state_dim] f32; slab: packed weights from pack_params()."""
    B = state.shape[0]
    A = num_actions
    if s_pad != state_dim:                           # no-op when state_dim % 8 == 0
        state = jnp.pad(state, ((0, 0), (0, s_pad - state_dim)))

    kernel = functools.partial(_fc_q_kernel, s_pad=s_pad, num_actions=A)
    vmem = pl.BlockSpec(memory_space=pltpu.MemorySpace.VMEM)
    packed = pl.pallas_call(
        kernel,
        out_shape=jax.ShapeDtypeStruct((B, 3 * A), jnp.float32),
        in_specs=[vmem, vmem],
        out_specs=vmem,
    )(state, slab)
    return packed[:, 0:A], packed[:, A:2 * A], packed[:, 2 * A:3 * A]


def init_params(key, state_dim, num_actions, unit=UNIT):
    """Deterministic PyTorch-Linear-style init: U(-1/sqrt(fan_in), 1/sqrt(fan_in))."""
    params = {}
    layer_shapes = {
        "q1": (unit, state_dim), "q2": (unit, unit), "q3": (num_actions, unit),
        "i1": (unit, state_dim), "i2": (unit, unit), "i3": (num_actions, unit),
    }
    for name, (out_f, in_f) in layer_shapes.items():
        key, kw, kb = jax.random.split(key, 3)
        bound = 1.0 / jnp.sqrt(in_f)
        params[name + "_w"] = jax.random.uniform(
            kw, (out_f, in_f), jnp.float32, -bound, bound)
        params[name + "_b"] = jax.random.uniform(
            kb, (out_f,), jnp.float32, -bound, bound)
    return params


def fc_q_reference(state, params):
    """Plain-JAX reference mirroring the PyTorch forward."""
    def lin(x, name):
        return x @ params[name + "_w"].T + params[name + "_b"]

    q = jax.nn.relu(lin(state, "q1"))
    q = jax.nn.relu(lin(q, "q2"))
    i = jax.nn.relu(lin(state, "i1"))
    i = jax.nn.relu(lin(i, "i2"))
    i = jax.nn.relu(lin(i, "i3"))
    return lin(q, "q3"), jax.nn.log_softmax(i, axis=1), i


if __name__ == "__main__":
    B, STATE_DIM, NUM_ACTIONS = 8, 24, 6

    key = jax.random.PRNGKey(0)
    key, kx = jax.random.split(key)
    state = jax.random.normal(kx, (B, STATE_DIM), dtype=jnp.float32)
    params = init_params(key, STATE_DIM, NUM_ACTIONS)

    # one-time weight packing (no per-call transposes/reshapes)
    slab, s_pad = pack_params(params, STATE_DIM, NUM_ACTIONS)
    slab = jax.block_until_ready(slab)

    fwd = jax.jit(functools.partial(
        fc_q_forward, state_dim=STATE_DIM, num_actions=NUM_ACTIONS, s_pad=s_pad))

    q_out, logp_out, i_out = jax.block_until_ready(fwd(state, slab))

    q_ref, logp_ref, i_ref = fc_q_reference(state, params)
    assert jnp.allclose(q_out, q_ref, atol=1e-5), "q mismatch"
    assert jnp.allclose(logp_out, logp_ref, atol=1e-5), "log_softmax mismatch"
    assert jnp.allclose(i_out, i_ref, atol=1e-5), "i mismatch"

    print("KERNEL_OK")
</pallas_src>

<mosaic_0001>
module attributes {stable_mosaic.version = 11 : i64} {
  func.func @_fc_q_kernel(%arg0: memref<8x24xf32, #tpu.memory_space<vmem>>, %arg1: memref<288x128xf32, #tpu.memory_space<vmem>>, %arg2: memref<8x18xf32, #tpu.memory_space<vmem>>) attributes {dimension_semantics = [], scalar_prefetch = 0 : i64, scratch_operands = 0 : i64, tpu.core_type = #tpu.core_type<tc>} {
    %c0 = arith.constant 0 : index
    %c0_0 = arith.constant 0 : index
    %0 = vector.load %arg0[%c0, %c0_0] : memref<8x24xf32, #tpu.memory_space<vmem>>, vector<8x24xf32>
    %c0_1 = arith.constant 0 : index
    %c0_2 = arith.constant 0 : index
    %1 = vector.load %arg1[%c0_1, %c0_2] : memref<288x128xf32, #tpu.memory_space<vmem>>, vector<24x128xf32>
    %c24 = arith.constant 24 : index
    %c0_3 = arith.constant 0 : index
    %2 = vector.load %arg1[%c24, %c0_3] : memref<288x128xf32, #tpu.memory_space<vmem>>, vector<128x128xf32>
    %c152 = arith.constant 152 : index
    %c0_4 = arith.constant 0 : index
    %3 = vector.load %arg1[%c152, %c0_4] : memref<288x128xf32, #tpu.memory_space<vmem>>, vector<128x128xf32>
    %c280 = arith.constant 280 : index
    %c0_5 = arith.constant 0 : index
    %4 = vector.load %arg1[%c280, %c0_5] : memref<288x128xf32, #tpu.memory_space<vmem>>, vector<8x128xf32>
    %5 = vector.extract_strided_slice %4 {offsets = [0, 0], sizes = [1, 128], strides = [1, 1]} : vector<8x128xf32> to vector<1x128xf32>
    %6 = vector.extract_strided_slice %4 {offsets = [1, 0], sizes = [1, 128], strides = [1, 1]} : vector<8x128xf32> to vector<1x128xf32>
    %7 = vector.extract_strided_slice %4 {offsets = [2, 0], sizes = [1, 128], strides = [1, 1]} : vector<8x128xf32> to vector<1x128xf32>
    %cst = arith.constant dense<0.000000e+00> : vector<8x128xf32>
    %8 = tpu.matmul %0, %1, %cst {dimension_numbers = #tpu.dot_dimension_numbers<[1], [0], [0], [1], [0, 0, 1, 1], [], []>} : vector<8x24xf32>, vector<24x128xf32>, vector<8x128xf32> -> vector<8x128xf32>
    %9 = vector.broadcast %5 : vector<1x128xf32> to vector<8x128xf32>
    %10 = arith.addf %8, %9 : vector<8x128xf32>
    %cst_6 = arith.constant 0.000000e+00 : f32
    %11 = vector.broadcast %cst_6 : f32 to vector<8x128xf32>
    %12 = arith.maximumf %10, %11 : vector<8x128xf32>
    %cst_7 = arith.constant dense<0.000000e+00> : vector<8x128xf32>
    %13 = tpu.matmul %12, %2, %cst_7 {dimension_numbers = #tpu.dot_dimension_numbers<[1], [0], [0], [1], [0, 0, 1, 1], [], []>} : vector<8x128xf32>, vector<128x128xf32>, vector<8x128xf32> -> vector<8x128xf32>
    %14 = vector.broadcast %6 : vector<1x128xf32> to vector<8x128xf32>
    %15 = arith.addf %13, %14 : vector<8x128xf32>
    %cst_8 = arith.constant 0.000000e+00 : f32
    %16 = vector.broadcast %cst_8 : f32 to vector<8x128xf32>
    %17 = arith.maximumf %15, %16 : vector<8x128xf32>
    %cst_9 = arith.constant dense<0.000000e+00> : vector<8x128xf32>
    %18 = tpu.matmul %17, %3, %cst_9 {dimension_numbers = #tpu.dot_dimension_numbers<[1], [0], [0], [1], [0, 0, 1, 1], [], []>} : vector<8x128xf32>, vector<128x128xf32>, vector<8x128xf32> -> vector<8x128xf32>
    %19 = vector.broadcast %7 : vector<1x128xf32> to vector<8x128xf32>
    %20 = arith.addf %18, %19 : vector<8x128xf32>
    %21 = vector.extract_strided_slice %20 {offsets = [0, 0], sizes = [8, 6], strides = [1, 1]} : vector<8x128xf32> to vector<8x6xf32>
    %22 = vector.extract_strided_slice %20 {offsets = [0, 6], sizes = [8, 6], strides = [1, 1]} : vector<8x128xf32> to vector<8x6xf32>
    %cst_10 = arith.constant 0.000000e+00 : f32
    %23 = vector.broadcast %cst_10 : f32 to vector<8x6xf32>
    %24 = arith.maximumf %22, %23 : vector<8x6xf32>
    %cst_11 = arith.constant dense<0xFF800000> : vector<8xf32>
    %25 = vector.multi_reduction <maximumf>, %24, %cst_11 [1] : vector<8x6xf32> to vector<8xf32>
    %26 = vector.shape_cast %25 : vector<8xf32> to vector<8x1xf32>
    %27 = vector.broadcast %26 : vector<8x1xf32> to vector<8x6xf32>
    %28 = arith.subf %24, %27 : vector<8x6xf32>
    %29 = math.exp %28 : vector<8x6xf32>
    %cst_12 = arith.constant dense<0.000000e+00> : vector<8xf32>
    %30 = vector.multi_reduction <add>, %29, %cst_12 [1] : vector<8x6xf32> to vector<8xf32>
    %31 = vector.shape_cast %30 : vector<8xf32> to vector<8x1xf32>
    %32 = math.log %31 : vector<8x1xf32>
    %33 = vector.broadcast %32 : vector<8x1xf32> to vector<8x6xf32>
    %34 = arith.subf %28, %33 : vector<8x6xf32>
    %c0_13 = arith.constant 0 : index
    %c0_14 = arith.constant 0 : index
    %35 = vector.load %arg2[%c0_13, %c0_14] : memref<8x18xf32, #tpu.memory_space<vmem>>, vector<8x6xf32>
    tpu.vector_store %arg2[%c0_13, %c0_14], %21 {strides = array<i32>} : memref<8x18xf32, #tpu.memory_space<vmem>>, vector<8x6xf32>,
    %c0_15 = arith.constant 0 : index
    %c6 = arith.constant 6 : index
    %36 = vector.load %arg2[%c0_15, %c6] : memref<8x18xf32, #tpu.memory_space<vmem>>, vector<8x6xf32>
    tpu.vector_store %arg2[%c0_15, %c6], %34 {strides = array<i32>} : memref<8x18xf32, #tpu.memory_space<vmem>>, vector<8x6xf32>,
    %c0_16 = arith.constant 0 : index
    %c12 = arith.constant 12 : index
    %37 = vector.load %arg2[%c0_16, %c12] : memref<8x18xf32, #tpu.memory_space<vmem>>, vector<8x6xf32>
    tpu.vector_store %arg2[%c0_16, %c12], %24 {strides = array<i32>} : memref<8x18xf32, #tpu.memory_space<vmem>>, vector<8x6xf32>,
    return
  }
}

</mosaic_0001>

<bundles_post_ra>
// kernel: fc_q_forward.1
= control target key start
LH: loop header
LB: loop body
LE: loop exit
PB: predicated region body
PF: predicated region fallthrough
CT: control target
= control target key end

     0   :  { %7 = vsyncpa [#allocation3], 0  ;;  %s592_s0 = inlined_call_operand.hbm [shape: f32[8,24], index: 0, kind: input, shape index: {}]   ;;  %s593_s1 = inlined_call_operand.hbm [shape: f32[288,128], index: 1, kind: input, shape index: {}]   ;;  %s594_s2 = inlined_call_operand.vmem [shape: f32[8,18], index: 2, kind: output, shape index: {}]  }
   0x1   :  { %8 = vsyncpa [#allocation5], 0  ;;  %s509_s9 = smov [#allocation2]   ;;  %s510_s11 = smov [#allocation4]  }
   0x2   :  { %s15_s10 = sshll.u32 %s509_s9, 4  ;;  %s24_s12 = sshll.u32 %s510_s11, 4  ;;  %s16_s10 = int_to_ptr.vmem [resolvable:$true] %s15_s10  ;;  %s25_s12 = int_to_ptr.vmem [resolvable:$true] %s24_s12 }
   0x3   :  { %s473_s13 = scalar_lea.vmem %s16_s10, 128  ;;  %p478_p1 = scmp.lt.s32.totalorder %s16_s10, %s16_s10 }
   0x4   :  { %p474_p0 = scmp.ne.s32.totalorder %s16_s10, %s473_s13  ;;  %p479_p2 = scmp.lt.s32.totalorder %s473_s13, %s473_s13 }
   0x6   :  { %p480_p3 = por %p479_p2, %p478_p1 }
   0x8   :  { %p481_p4 = pnand %p480_p3, %p474_p0 }
   0xa   :  { %484 = shalt.err (!%p481_p4)
}
   0xb   :  { %18 = dma.hbm_to_vmem [thread:$0]  %s592_s0, 128, %s16_s10, [#allocation3]  }
   0xc   :  { %s493_s16 = scalar_lea.vmem %s25_s12, 4608  ;;  %p498_p6 = scmp.lt.s32.totalorder %s25_s12, %s25_s12 }
   0xd   :  { %p494_p5 = scmp.ne.s32.totalorder %s25_s12, %s493_s16  ;;  %p499_p7 = scmp.lt.s32.totalorder %s493_s16, %s493_s16 }
   0xf   :  { %p500_p8 = por %p499_p7, %p498_p6 }
  0x11   :  { %p501_p9 = pnand %p500_p8, %p494_p5 }
  0x13   :  { %504 = shalt.err (!%p501_p9)
}
  0x14   :  { %s511_s17 = smov 128   ;;  %s512_s18 = smov 8  }
  0x15   :  { %30 = dma.hbm_to_vmem [thread:$0]  %s593_s1, 4608, %s25_s12, [#allocation5], %s511_s17, %s511_s17, %s512_s18  }
  0x16   :  { %505 = dma.done.wait [#allocation3], 128  }
  0x17   :  { %506 = vsyncadd [#allocation3], 4294967168 }
  0x18   :  { %507 = dma.done.wait [#allocation5], 4608  }
  0x19   :  { %508 = vsyncadd [#allocation5], 4294962688  ;;  %v513_v0 = vmov 0.0   ;;  %vm514_vm0 = vmmov 0   ;;  %v40_v1 = vld [vmem:[#allocation4 + $0x10] sm:$0xff]  ;;  %v39_v2 = vld [vmem:[#allocation4 + $0x8] sm:$0xff]  ;;  %v74_v34 = vlaneseq }
  0x1a   :  { %374 = vmatprep.subr.mxu0 %v513_v0  ;;  %380 = vmatprep.mubr.msk.f32.mxu0 %vm514_vm0, %v513_v0  ;;  %v56_v3 = vld [vmem:[#allocation4 + $0x90] sm:$0xff]  ;;  %v55_v4 = vld [vmem:[#allocation4 + $0x88] sm:$0xff]  ;;  %v38_v5 = vld [vmem:[#allocation4] sm:$0xff]  ;;  %vm78_vm1 = vcmask 195584   ;;  %vm314_vm2 = vcmask 48128   ;;  %vm303_vm3 = vcmask 97328  }
  0x1b   :  { %383 = vmatprep.subr.mxu1 %v513_v0  ;;  %415 = vmatprep.mubr.msk.f32.mxu1 %vm514_vm0, %v513_v0  ;;  %v37_v6 = vld [vmem:[#allocation2] sm:$0xff]  ;;  %v54_v7 = vld [vmem:[#allocation4 + $0x80] sm:$0xff]  ;;  %v52_v9 = vld [vmem:[#allocation4 + $0x70] sm:$0xff]  ;;  %v75_v35 = vshrl.u32 %v74_v34, 7  ;;  %s515_s21 = smov 122   ;;  %s516_s22 = smov 6  }
  0x1c   :  { %375 = vmatpush3.msra.mxu0 %v40_v1  ;;  %384 = vmatpush3.msra.mxu1 %v56_v3  ;;  %v53_v8 = vld [vmem:[#allocation4 + $0x78] sm:$0xff]  ;;  %v51_v10 = vld [vmem:[#allocation4 + $0x68] sm:$0xff]  ;;  %v50_v11 = vld [vmem:[#allocation4 + $0x60] sm:$0xff]  ;;  %vm327_vm4 = vcmask 146528  }
  0x1d   :  { %376 = vmatprep.subr.mxu0 %v513_v0  ;;  %385 = vmatprep.subr.mxu1 %v513_v0  ;;  %v49_v12 = vld [vmem:[#allocation4 + $0x58] sm:$0xff]  ;;  %v48_v13 = vld [vmem:[#allocation4 + $0x50] sm:$0xff]  ;;  %v47_v14 = vld [vmem:[#allocation4 + $0x48] sm:$0xff]  ;;  %v76_v36 = vsub.s32 0, %v75_v35  ;;  %v155_v46 = vsub.s32 1, %v75_v35  ;;  %v230_v52 = vsub.s32 2, %v75_v35 }
  0x1e   :  { %377 = vmatpush3.msra.mxu0 %v39_v2  ;;  %386 = vmatpush3.msra.mxu1 %v55_v4  ;;  %v46_v15 = vld [vmem:[#allocation4 + $0x40] sm:$0xff]  ;;  %v45_v16 = vld [vmem:[#allocation4 + $0x38] sm:$0xff]  ;;  %v44_v17 = vld [vmem:[#allocation4 + $0x30] sm:$0xff] }
  0x1f   :  { %378 = vmatprep.subr.mxu0 %v513_v0  ;;  %387 = vmatprep.subr.mxu1 %v513_v0  ;;  %v43_v18 = vld [vmem:[#allocation4 + $0x28] sm:$0xff]  ;;  %v42_v19 = vld [vmem:[#allocation4 + $0x20] sm:$0xff]  ;;  %v41_v20 = vld [vmem:[#allocation4 + $0x18] sm:$0xff] }
  0x20   :  { %379 = vmatpush3.msra.mxu0 %v38_v5  ;;  %388 = vmatpush3.msra.mxu1 %v54_v7  ;;  %v72_v21 = vld [vmem:[#allocation4 + $0x110] sm:$0xff]  ;;  %v71_v22 = vld [vmem:[#allocation4 + $0x108] sm:$0xff]  ;;  %v70_v23 = vld [vmem:[#allocation4 + $0x100] sm:$0xff] }
  0x21   :  { %381 = vmatmul.mubr.msk.f32.vlgmr.msra.gmra.mxu0 %vm78_vm1, %v37_v6  ;;  %389 = vmatprep.subr.mxu1 %v513_v0  ;;  %v69_v24 = vld [vmem:[#allocation4 + $0xf8] sm:$0xff]  ;;  %v68_v25 = vld [vmem:[#allocation4 + $0xf0] sm:$0xff]  ;;  %v67_v26 = vld [vmem:[#allocation4 + $0xe8] sm:$0xff] }
  0x22   :  { %418 = vmatprep.subr.mxu0 %v513_v0  ;;  %390 = vmatpush3.msra.mxu1 %v53_v8  ;;  %v66_v27 = vld [vmem:[#allocation4 + $0xe0] sm:$0xff]  ;;  %v65_v28 = vld [vmem:[#allocation4 + $0xd8] sm:$0xff]  ;;  %v64_v29 = vld [vmem:[#allocation4 + $0xd0] sm:$0xff] }
  0x23   :  { %450 = vmatprep.mubr.msk.f32.mxu0 %vm514_vm0, %v513_v0  ;;  %391 = vmatprep.subr.mxu1 %v513_v0  ;;  %v63_v30 = vld [vmem:[#allocation4 + $0xc8] sm:$0xff]  ;;  %v62_v31 = vld [vmem:[#allocation4 + $0xc0] sm:$0xff]  ;;  %v61_v32 = vld [vmem:[#allocation4 + $0xb8] sm:$0xff] }
  0x24   :  { %392 = vmatpush3.msra.mxu1 %v52_v9  ;;  %419 = vmatpush3.msra.mxu0 %v72_v21  ;;  %v60_v33 = vld [vmem:[#allocation4 + $0xb0] sm:$0xff]  ;;  %v73_v37 = vld [vmem:[#allocation4 + $0x118] sm:$0xff]  ;;  %v59_v43 = vld [vmem:[#allocation4 + $0xa8] sm:$0xff] }
  0x25   :  { %393 = vmatprep.subr.mxu1 %v513_v0  ;;  %420 = vmatprep.subr.mxu0 %v513_v0  ;;  %v77_v38 = vrot.slane %v73_v37, %v76_v36  ;;  %v58_v44 = vld [vmem:[#allocation4 + $0xa0] sm:$0xff]  ;;  %v57_v45 = vld [vmem:[#allocation4 + $0x98] sm:$0xff]  ;;  %v156_v47 = vrot.slane %v73_v37, %v155_v46  ;;  %v231_v53 = vrot.slane %v73_v37, %v230_v52 }
  0x26   :  { %394 = vmatpush3.msra.mxu1 %v51_v10  ;;  %421 = vmatpush3.msra.mxu0 %v71_v22 }
  0x27   :  { %395 = vmatprep.subr.mxu1 %v513_v0  ;;  %422 = vmatprep.subr.mxu0 %v513_v0 }
  0x28   :  { %396 = vmatpush3.msra.mxu1 %v50_v11  ;;  %423 = vmatpush3.msra.mxu0 %v70_v23 }
  0x29   :  { %397 = vmatprep.subr.mxu1 %v513_v0  ;;  %424 = vmatprep.subr.mxu0 %v513_v0 }
  0x2a   :  { %398 = vmatpush3.msra.mxu1 %v49_v12  ;;  %425 = vmatpush3.msra.mxu0 %v69_v24 }
  0x2b   :  { %399 = vmatprep.subr.mxu1 %v513_v0  ;;  %426 = vmatprep.subr.mxu0 %v513_v0 }
  0x2c   :  { %400 = vmatpush3.msra.mxu1 %v48_v13  ;;  %427 = vmatpush3.msra.mxu0 %v68_v25 }
  0x2d   :  { %401 = vmatprep.subr.mxu1 %v513_v0  ;;  %428 = vmatprep.subr.mxu0 %v513_v0 }
  0x2e   :  { %402 = vmatpush3.msra.mxu1 %v47_v14  ;;  %429 = vmatpush3.msra.mxu0 %v67_v26 }
  0x2f   :  { %403 = vmatprep.subr.mxu1 %v513_v0  ;;  %430 = vmatprep.subr.mxu0 %v513_v0 }
  0x30   :  { %404 = vmatpush3.msra.mxu1 %v46_v15  ;;  %431 = vmatpush3.msra.mxu0 %v66_v27 }
  0x31   :  { %405 = vmatprep.subr.mxu1 %v513_v0  ;;  %432 = vmatprep.subr.mxu0 %v513_v0 }
  0x32   :  { %406 = vmatpush3.msra.mxu1 %v45_v16  ;;  %433 = vmatpush3.msra.mxu0 %v65_v28 }
  0x33   :  { %407 = vmatprep.subr.mxu1 %v513_v0  ;;  %434 = vmatprep.subr.mxu0 %v513_v0 }
  0x34   :  { %408 = vmatpush3.msra.mxu1 %v44_v17  ;;  %435 = vmatpush3.msra.mxu0 %v64_v29 }
  0x35   :  { %409 = vmatprep.subr.mxu1 %v513_v0  ;;  %436 = vmatprep.subr.mxu0 %v513_v0 }
  0x36   :  { %410 = vmatpush3.msra.mxu1 %v43_v18  ;;  %437 = vmatpush3.msra.mxu0 %v63_v30 }
  0x37   :  { %411 = vmatprep.subr.mxu1 %v513_v0  ;;  %438 = vmatprep.subr.mxu0 %v513_v0 }
  0x38   :  { %412 = vmatpush3.msra.mxu1 %v42_v19  ;;  %439 = vmatpush3.msra.mxu0 %v62_v31 }
  0x39   :  { %413 = vmatprep.subr.mxu1 %v513_v0  ;;  %440 = vmatprep.subr.mxu0 %v513_v0 }
  0x3a   :  { %414 = vmatpush3.msra.mxu1 %v41_v20  ;;  %441 = vmatpush3.msra.mxu0 %v61_v32 }
  0x3b   :  { %442 = vmatprep.subr.mxu0 %v513_v0 }
  0x3c   :  { %443 = vmatpush3.msra.mxu0 %v60_v33 }
  0x3d   :  { %444 = vmatprep.subr.mxu0 %v513_v0 }
  0x3e   :  { %445 = vmatpush3.msra.mxu0 %v59_v43 }
  0x3f   :  { %446 = vmatprep.subr.mxu0 %v513_v0 }
  0x40   :  { %447 = vmatpush3.msra.mxu0 %v58_v44 }
  0x41   :  { %448 = vmatprep.subr.mxu0 %v513_v0 }
  0x42   :  { %449 = vmatpush3.msra.mxu0 %v57_v45 }
  0xe1   :  { %v148_v39 = vpop.f32.mrf.mxu0 }
  0xe2   :  { %v149_v40 = vadd.f32 %v148_v39, %v77_v38 }
  0xe3   :  { %v382_v41 = vpop.f32.mrf.mxu0 }
  0xe4   :  { %v152_v42 = vmax.f32 %v149_v40, 0.0 }
  0xe6   :  { %416 = vmatmul.mubr.f32.vlgmr.msra.gmra.mxu1 %v152_v42 }
 0x1a6   :  { %v223_v48 = vpop.f32.mrf.mxu1 }
 0x1a7   :  { %v224_v49 = vadd.f32 %v223_v48, %v156_v47 }
 0x1a8   :  { %v417_v50 = vpop.f32.mrf.mxu1 }
 0x1a9   :  { %v227_v51 = vmax.f32 %v224_v49, 0.0 }
 0x1ab   :  { %451 = vmatmul.mubr.f32.vlgmr.msra.gmra.mxu0 %v227_v51 }
 0x26b   :  { %v298_v54 = vpop.f32.mrf.mxu0 }
 0x26c   :  { %v299_v55 = vadd.f32 %v298_v54, %v231_v53 }
 0x26d   :  { %v452_v56 = vpop.f32.mrf.mxu0 }
 0x26e   :  { %v302_v57 = vmax.f32 %v299_v55, 0.0  ;;  %321 = vst.msk [vmem:[%s594_s2] sm:$0xff] %vm314_vm2, %v299_v55 }
 0x270   :  { %v304_v58 = vsel %vm303_vm3, %v302_v57, -inf }
 0x271   :  { %305 = vmax.xlane.f32.xlu0 %v304_v58 }
 0x2fa   :  { %v306_v59 = vpop.xlane.xlu0 %305 }
 0x2fb   :  { %v307_v60 = vsub.f32 %v302_v57, %v306_v59 }
 0x2fd   :  { %v308_v61 = vmul.f32 1.442695, %v307_v60 }
 0x2ff   :  { %461 = vpow2.f32 %v308_v61 }
 0x30c   :  { %v462_v62 = vpop.eup %461 }
 0x30d   :  { %311 = vrot.lane.b32.xlu0 %v462_v62, %s515_s21 }
 0x37f   :  { %v312_v63 = vpop.permute.xlu0 %311 }
 0x380   :  { %v315_v0 = vsel %vm314_vm2, %v312_v63, 0.0 }
 0x381   :  { %316 = vadd.xlane.f32.xlu1 %v315_v0 }
 0x392   :  { %324 = vrot.lane.b32.xlu1 %v302_v57, %s516_s22 }
 0x40a   :  { %v317_v1 = vpop.xlane.xlu1 %316 }
 0x40b   :  { %463 = vlog2.f32 %v317_v1 }
 0x40e   :  { %v325_v5 = vpop.permute.xlu1 %324 }
 0x418   :  { %v464_v2 = vpop.eup %463 }
 0x419   :  { %v319_v3 = vmul.f32 0.6931472, %v464_v2 }
 0x41b   :  { %v320_v4 = vsub.f32 %v307_v60, %v319_v3 }
 0x41d   :  { %322 = vst.msk [vmem:[%s594_s2] sm:$0xff] %vm303_vm3, %v320_v4 }
 0x41e   :  { %328 = vst.msk [vmem:[%s594_s2] sm:$0xff] %vm327_vm4, %v325_v5 }
 0x41f   :  { %333 = vsyncpa [#allocation3], 1 }
 0x420   :  { %334 = vsyncpa [#allocation5], 1 }

</bundles_post_ra>
